<compile_context>
chip_gen: v7x
topology: tpu7x:2x2x1
jax: 0.10.0
libtpu: 0.0.40
codegen_flags: <defaults>
</compile_context>

<pallas_src>
import jax
import jax.numpy as jnp
from jax.experimental import pallas as pl
from jax.experimental.pallas import tpu as pltpu

B, S, H, F, VOCAB = 2, 8, 32, 64, 50
N_ENC = 2            # code encoder + nl encoder, fused into a single launch
OUT_PAD = 128        # lane-dense output width; real pooler output is [:, :H]
LN_EPS = 1e-12

# Row indices inside the packed (12, H) bias / LayerNorm-vector slab.
LN0G, LN0B, BQ, BK, BV, BO, LN1G, LN1B, B2, LN2G, LN2B, BP = range(12)
# Matrix indices inside the packed (5, H, H) weight slab.
WQ, WK, WV, WO, WP = range(5)


def _layernorm(x, g, b):
    mu = jnp.mean(x, axis=-1, keepdims=True)
    var = jnp.mean((x - mu) ** 2, axis=-1, keepdims=True)
    return (x - mu) * jax.lax.rsqrt(var + LN_EPS) * g + b


def dual_encoder_kernel(ids_ref, mask_ref, tok_ref, pos_ref,
                        w_hh_ref, w1_ref, w2_ref, vecs_ref, b1_ref,
                        out_ref):
    """One grid step == one encoder (code or nl) over the whole batch."""
    ids = ids_ref[0]          # (B*S, 1) int32 token ids (row = b*S + s)
    maskf = mask_ref[0]       # (B, B*S) block-diagonal key mask (1 = keep)
    tok = tok_ref[0]          # (VOCAB, H) token-embedding table
    pos = pos_ref[0]          # (B*S, H) batch-tiled position embeddings
    w1 = w1_ref[0]            # (H, F)
    w2 = w2_ref[0]            # (F, H)
    vecs = vecs_ref[0]        # (12, H) packed biases / LN params
    b1 = b1_ref[0]            # (1, F)

    def vrow(i):
        return vecs[i:i + 1, :]            # (1, H) static slice

    def wmat(i):
        return w_hh_ref[0, i, :, :]        # (H, H) static slice

    # In-kernel embedding gather: one-hot(ids) @ tok_emb + position embeddings.
    iota_v = jax.lax.broadcasted_iota(jnp.int32, (B * S, VOCAB), 1)
    onehot = (ids == iota_v).astype(jnp.float32)                        # (B*S, VOCAB)
    x = jnp.dot(onehot, tok, preferred_element_type=jnp.float32) + pos  # (B*S, H)

    # Embedding layernorm over all tokens.
    h = _layernorm(x, vrow(LN0G), vrow(LN0B))                           # (B*S, H)

    # Self-attention (single head over the full hidden dim).
    # TODO(synk): multi-head split of H into (num_heads, head_dim) not done;
    # single-head attention keeps the lane layout simple at these tiny sizes.
    # K/V projections need every token; everything downstream feeds only the
    # pooler (CLS row), so the query / FFN path is restricted to the CLS rows.
    k = jnp.dot(h, wmat(WK), preferred_element_type=jnp.float32) + vrow(BK)
    v = jnp.dot(h, wmat(WV), preferred_element_type=jnp.float32) + vrow(BV)

    h_cls = jnp.concatenate([h[b * S:b * S + 1, :] for b in range(B)], axis=0)  # (B, H)
    q = jnp.dot(h_cls, wmat(WQ), preferred_element_type=jnp.float32) + vrow(BQ)

    scale = 1.0 / jnp.sqrt(jnp.float32(H))
    s = jnp.einsum('bh,kh->bk', q, k, preferred_element_type=jnp.float32) * scale
    s = s + (1.0 - maskf) * (-1e9)          # masks padding AND cross-batch keys
    s = s - jnp.max(s, axis=-1, keepdims=True)
    p = jnp.exp(s)
    p = p * pl.reciprocal(jnp.sum(p, axis=-1, keepdims=True), approx=True)

    ctx = jnp.dot(p, v, preferred_element_type=jnp.float32)              # (B, H)
    attn_out = jnp.dot(ctx, wmat(WO), preferred_element_type=jnp.float32) + vrow(BO)
    h1 = _layernorm(h_cls + attn_out, vrow(LN1G), vrow(LN1B))            # (B, H)

    # Feed-forward block (CLS rows only).
    f = jax.nn.gelu(jnp.dot(h1, w1, preferred_element_type=jnp.float32) + b1)
    ffn_out = jnp.dot(f, w2, preferred_element_type=jnp.float32) + vrow(B2)
    h2 = _layernorm(h1 + ffn_out, vrow(LN2G), vrow(LN2B))                # (B, H)

    # BERT-style pooler: tanh(dense(first token)).
    pooled = jnp.tanh(jnp.dot(h2, wmat(WP), preferred_element_type=jnp.float32)
                      + vrow(BP))                                        # (B, H)

    # Lane-dense (128-wide) writeback; the wrapper strips the padding.
    out_ref[0] = jnp.concatenate(
        [pooled, jnp.zeros((B, OUT_PAD - H), jnp.float32)], axis=1)


def init_encoder_params(key):
    keys = jax.random.split(key, 9)

    def dense(k, shape, scale=0.02):
        return (scale * jax.random.normal(k, shape)).astype(jnp.float32)

    ones = lambda shp: jnp.ones(shp, jnp.float32)
    zeros = lambda shp: jnp.zeros(shp, jnp.float32)
    return {
        'tok_emb': dense(keys[0], (VOCAB, H)),
        'pos_emb': dense(keys[1], (S, H)),
        'ln0g': ones((1, H)), 'ln0b': zeros((1, H)),
        'wq': dense(keys[2], (H, H)), 'bq': zeros((1, H)),
        'wk': dense(keys[3], (H, H)), 'bk': zeros((1, H)),
        'wv': dense(keys[4], (H, H)), 'bv': zeros((1, H)),
        'wo': dense(keys[5], (H, H)), 'bo': zeros((1, H)),
        'ln1g': ones((1, H)), 'ln1b': zeros((1, H)),
        'w1': dense(keys[6], (H, F)), 'b1': zeros((1, F)),
        'w2': dense(keys[7], (F, H)), 'b2': zeros((1, H)),
        'ln2g': ones((1, H)), 'ln2b': zeros((1, H)),
        'wp': dense(keys[8], (H, H)), 'bp': zeros((1, H)),
    }


def _pack_one(p):
    """Pack one encoder's params into a few dense slabs (done once, at init)."""
    w_hh = jnp.stack([p['wq'], p['wk'], p['wv'], p['wo'], p['wp']], axis=0)   # (5,H,H)
    vecs = jnp.concatenate(
        [p['ln0g'], p['ln0b'], p['bq'], p['bk'], p['bv'], p['bo'],
         p['ln1g'], p['ln1b'], p['b2'], p['ln2g'], p['ln2b'], p['bp']],
        axis=0)                                                                # (12,H)
    return {'tok': p['tok_emb'],
            'pos': jnp.tile(p['pos_emb'], (B, 1)),                             # (B*S,H)
            'w_hh': w_hh, 'w1': p['w1'], 'w2': p['w2'],
            'vecs': vecs, 'b1': p['b1']}


def pack_dual_params(code_params, nl_params):
    pc, pn = _pack_one(code_params), _pack_one(nl_params)
    return {k: jnp.stack([pc[k], pn[k]], axis=0) for k in pc}


def _expand_mask(mask):
    """(B, S) keep-mask -> (B, B*S) block-diagonal key mask for the fused batch."""
    eye = jnp.eye(B, dtype=jnp.float32)
    return (eye[:, :, None] * mask.astype(jnp.float32)[None, :, :]).reshape(B, B * S)


@jax.jit
def dual_encoder_forward(input_ids_code, input_ids_nl,
                         attention_mask_code, attention_mask_nl, packed):
    ids = jnp.stack([input_ids_code.reshape(B * S, 1),
                     input_ids_nl.reshape(B * S, 1)], axis=0).astype(jnp.int32)
    maskf = jnp.stack([_expand_mask(attention_mask_code),
                       _expand_mask(attention_mask_nl)], axis=0)

    out = pl.pallas_call(
        dual_encoder_kernel,
        out_shape=jax.ShapeDtypeStruct((N_ENC, B, OUT_PAD), jnp.float32),
        grid=(N_ENC,),
        in_specs=[
            pl.BlockSpec((1, B * S, 1), lambda e: (e, 0, 0)),       # token ids
            pl.BlockSpec((1, B, B * S), lambda e: (e, 0, 0)),       # key mask
            pl.BlockSpec((1, VOCAB, H), lambda e: (e, 0, 0)),       # tok_emb
            pl.BlockSpec((1, B * S, H), lambda e: (e, 0, 0)),       # pos_emb (tiled)
            pl.BlockSpec((1, 5, H, H), lambda e: (e, 0, 0, 0)),     # wq/wk/wv/wo/wp
            pl.BlockSpec((1, H, F), lambda e: (e, 0, 0)),           # w1
            pl.BlockSpec((1, F, H), lambda e: (e, 0, 0)),           # w2
            pl.BlockSpec((1, 12, H), lambda e: (e, 0, 0)),          # packed biases/LN
            pl.BlockSpec((1, 1, F), lambda e: (e, 0, 0)),           # b1
        ],
        out_specs=pl.BlockSpec((1, B, OUT_PAD), lambda e: (e, 0, 0)),
        compiler_params=pltpu.CompilerParams(
            dimension_semantics=("parallel",)),
    )(ids, maskf, packed['tok'], packed['pos'], packed['w_hh'],
      packed['w1'], packed['w2'], packed['vecs'], packed['b1'])

    pooled = out[:, :, :H]               # strip lane padding
    return pooled[0], pooled[1]          # (code pooler_output, nl pooler_output)


if __name__ == "__main__":
    key = jax.random.PRNGKey(0)
    k_code, k_nl, k_ids1, k_ids2 = jax.random.split(key, 4)

    code_params = init_encoder_params(k_code)
    nl_params = init_encoder_params(k_nl)
    packed = pack_dual_params(code_params, nl_params)   # one-time, at "module init"

    ids_code = jax.random.randint(k_ids1, (B, S), 0, VOCAB, dtype=jnp.int32)
    ids_nl = jax.random.randint(k_ids2, (B, S), 0, VOCAB, dtype=jnp.int32)
    mask_code = jnp.ones((B, S), jnp.float32).at[:, S - 2:].set(0.0)
    mask_nl = jnp.ones((B, S), jnp.float32).at[:, S - 3:].set(0.0)

    emb_code, emb_nl = dual_encoder_forward(ids_code, ids_nl,
                                            mask_code, mask_nl, packed)
    jax.block_until_ready((emb_code, emb_nl))
    assert emb_code.shape == (B, H) and emb_nl.shape == (B, H)
    assert emb_code.dtype == jnp.float32 and emb_nl.dtype == jnp.float32
    assert bool(jnp.all(jnp.isfinite(emb_code))) and bool(jnp.all(jnp.isfinite(emb_nl)))
    print("KERNEL_OK")
</pallas_src>

<mosaic_0001>
module attributes {stable_mosaic.version = 11 : i64} {
  func.func @dual_encoder_kernel(%arg0: i32, %arg1: memref<1x16x1xi32, #tpu.memory_space<vmem>>, %arg2: memref<1x2x16xf32, #tpu.memory_space<vmem>>, %arg3: memref<1x50x32xf32, #tpu.memory_space<vmem>>, %arg4: memref<1x16x32xf32, #tpu.memory_space<vmem>>, %arg5: memref<1x5x32x32xf32, #tpu.memory_space<vmem>>, %arg6: memref<1x32x64xf32, #tpu.memory_space<vmem>>, %arg7: memref<1x64x32xf32, #tpu.memory_space<vmem>>, %arg8: memref<1x12x32xf32, #tpu.memory_space<vmem>>, %arg9: memref<1x1x64xf32, #tpu.memory_space<vmem>>, %arg10: memref<1x2x128xf32, #tpu.memory_space<vmem>>) attributes {dimension_semantics = [#tpu.dimension_semantics<parallel>], iteration_bounds = array<i64: 2>, scalar_prefetch = 0 : i64, scratch_operands = 0 : i64, tpu.core_type = #tpu.core_type<tc>, window_params = [{transform_indices = @transform_0, window_bounds = array<i64: 1, 16, 1>}, {transform_indices = @transform_1, window_bounds = array<i64: 1, 2, 16>}, {transform_indices = @transform_2, window_bounds = array<i64: 1, 50, 32>}, {transform_indices = @transform_3, window_bounds = array<i64: 1, 16, 32>}, {transform_indices = @transform_4, window_bounds = array<i64: 1, 5, 32, 32>}, {transform_indices = @transform_5, window_bounds = array<i64: 1, 32, 64>}, {transform_indices = @transform_6, window_bounds = array<i64: 1, 64, 32>}, {transform_indices = @transform_7, window_bounds = array<i64: 1, 12, 32>}, {transform_indices = @transform_8, window_bounds = array<i64: 1, 1, 64>}, {transform_indices = @transform_9, window_bounds = array<i64: 1, 2, 128>}]} {
    %c0 = arith.constant 0 : index
    %c0_0 = arith.constant 0 : index
    %c0_1 = arith.constant 0 : index
    %0 = vector.load %arg1[%c0, %c0_0, %c0_1] : memref<1x16x1xi32, #tpu.memory_space<vmem>>, vector<1x16x1xi32>
    %1 = vector.shape_cast %0 : vector<1x16x1xi32> to vector<16x1xi32>
    %c0_2 = arith.constant 0 : index
    %c0_3 = arith.constant 0 : index
    %c0_4 = arith.constant 0 : index
    %2 = vector.load %arg2[%c0_2, %c0_3, %c0_4] : memref<1x2x16xf32, #tpu.memory_space<vmem>>, vector<1x2x16xf32>
    %3 = vector.shape_cast %2 : vector<1x2x16xf32> to vector<2x16xf32>
    %c0_5 = arith.constant 0 : index
    %c0_6 = arith.constant 0 : index
    %c0_7 = arith.constant 0 : index
    %4 = vector.load %arg3[%c0_5, %c0_6, %c0_7] : memref<1x50x32xf32, #tpu.memory_space<vmem>>, vector<1x50x32xf32>
    %5 = vector.shape_cast %4 : vector<1x50x32xf32> to vector<50x32xf32>
    %c0_8 = arith.constant 0 : index
    %c0_9 = arith.constant 0 : index
    %c0_10 = arith.constant 0 : index
    %6 = vector.load %arg4[%c0_8, %c0_9, %c0_10] : memref<1x16x32xf32, #tpu.memory_space<vmem>>, vector<1x16x32xf32>
    %7 = vector.shape_cast %6 : vector<1x16x32xf32> to vector<16x32xf32>
    %c0_11 = arith.constant 0 : index
    %c0_12 = arith.constant 0 : index
    %c0_13 = arith.constant 0 : index
    %8 = vector.load %arg6[%c0_11, %c0_12, %c0_13] : memref<1x32x64xf32, #tpu.memory_space<vmem>>, vector<1x32x64xf32>
    %9 = vector.shape_cast %8 : vector<1x32x64xf32> to vector<32x64xf32>
    %c0_14 = arith.constant 0 : index
    %c0_15 = arith.constant 0 : index
    %c0_16 = arith.constant 0 : index
    %10 = vector.load %arg7[%c0_14, %c0_15, %c0_16] : memref<1x64x32xf32, #tpu.memory_space<vmem>>, vector<1x64x32xf32>
    %11 = vector.shape_cast %10 : vector<1x64x32xf32> to vector<64x32xf32>
    %c0_17 = arith.constant 0 : index
    %c0_18 = arith.constant 0 : index
    %c0_19 = arith.constant 0 : index
    %12 = vector.load %arg8[%c0_17, %c0_18, %c0_19] : memref<1x12x32xf32, #tpu.memory_space<vmem>>, vector<1x12x32xf32>
    %13 = vector.shape_cast %12 : vector<1x12x32xf32> to vector<12x32xf32>
    %c0_20 = arith.constant 0 : index
    %c0_21 = arith.constant 0 : index
    %c0_22 = arith.constant 0 : index
    %14 = vector.load %arg9[%c0_20, %c0_21, %c0_22] : memref<1x1x64xf32, #tpu.memory_space<vmem>>, vector<1x1x64xf32>
    %15 = vector.shape_cast %14 : vector<1x1x64xf32> to vector<1x64xf32>
    %16 = tpu.iota {dimensions = array<i32: 1>} : vector<16x50xi32>
    %17 = vector.broadcast %1 : vector<16x1xi32> to vector<16x50xi32>
    %18 = arith.cmpi eq, %17, %16 : vector<16x50xi32>
    %19 = arith.extui %18 : vector<16x50xi1> to vector<16x50xi32>
    %20 = arith.sitofp %19 : vector<16x50xi32> to vector<16x50xf32>
    %cst = arith.constant dense<0.000000e+00> : vector<16x32xf32>
    %21 = tpu.matmul %20, %5, %cst {dimension_numbers = #tpu.dot_dimension_numbers<[1], [0], [0], [1], [0, 0, 1, 1], [], []>} : vector<16x50xf32>, vector<50x32xf32>, vector<16x32xf32> -> vector<16x32xf32>
    %22 = arith.addf %21, %7 : vector<16x32xf32>
    %23 = vector.extract_strided_slice %13 {offsets = [0, 0], sizes = [1, 32], strides = [1, 1]} : vector<12x32xf32> to vector<1x32xf32>
    %24 = vector.extract_strided_slice %13 {offsets = [1, 0], sizes = [1, 32], strides = [1, 1]} : vector<12x32xf32> to vector<1x32xf32>
    %cst_23 = arith.constant dense<0.000000e+00> : vector<16xf32>
    %25 = vector.multi_reduction <add>, %22, %cst_23 [1] : vector<16x32xf32> to vector<16xf32>
    %26 = vector.shape_cast %25 : vector<16xf32> to vector<16x1xf32>
    %cst_24 = arith.constant 3.200000e+01 : f32
    %27 = vector.broadcast %cst_24 : f32 to vector<16x1xf32>
    %28 = arith.divf %26, %27 : vector<16x1xf32>
    %29 = vector.broadcast %28 : vector<16x1xf32> to vector<16x32xf32>
    %30 = arith.subf %22, %29 : vector<16x32xf32>
    %31 = arith.mulf %30, %30 : vector<16x32xf32>
    %cst_25 = arith.constant dense<0.000000e+00> : vector<16xf32>
    %32 = vector.multi_reduction <add>, %31, %cst_25 [1] : vector<16x32xf32> to vector<16xf32>
    %33 = vector.shape_cast %32 : vector<16xf32> to vector<16x1xf32>
    %cst_26 = arith.constant 3.200000e+01 : f32
    %34 = vector.broadcast %cst_26 : f32 to vector<16x1xf32>
    %35 = arith.divf %33, %34 : vector<16x1xf32>
    %36 = vector.broadcast %28 : vector<16x1xf32> to vector<16x32xf32>
    %37 = arith.subf %22, %36 : vector<16x32xf32>
    %cst_27 = arith.constant 9.99999996E-13 : f32
    %38 = vector.broadcast %cst_27 : f32 to vector<16x1xf32>
    %39 = arith.addf %35, %38 : vector<16x1xf32>
    %40 = math.rsqrt %39 : vector<16x1xf32>
    %41 = vector.broadcast %40 : vector<16x1xf32> to vector<16x32xf32>
    %42 = arith.mulf %37, %41 : vector<16x32xf32>
    %43 = vector.broadcast %23 : vector<1x32xf32> to vector<16x32xf32>
    %44 = arith.mulf %42, %43 : vector<16x32xf32>
    %45 = vector.broadcast %24 : vector<1x32xf32> to vector<16x32xf32>
    %46 = arith.addf %44, %45 : vector<16x32xf32>
    %c0_28 = arith.constant 0 : index
    %c1 = arith.constant 1 : index
    %c0_29 = arith.constant 0 : index
    %c0_30 = arith.constant 0 : index
    %47 = vector.load %arg5[%c0_28, %c1, %c0_29, %c0_30] : memref<1x5x32x32xf32, #tpu.memory_space<vmem>>, vector<1x1x32x32xf32>
    %48 = vector.shape_cast %47 : vector<1x1x32x32xf32> to vector<32x32xf32>
    %cst_31 = arith.constant dense<0.000000e+00> : vector<16x32xf32>
    %49 = tpu.matmul %46, %48, %cst_31 {dimension_numbers = #tpu.dot_dimension_numbers<[1], [0], [0], [1], [0, 0, 1, 1], [], []>} : vector<16x32xf32>, vector<32x32xf32>, vector<16x32xf32> -> vector<16x32xf32>
    %50 = vector.extract_strided_slice %13 {offsets = [3, 0], sizes = [1, 32], strides = [1, 1]} : vector<12x32xf32> to vector<1x32xf32>
    %51 = vector.broadcast %50 : vector<1x32xf32> to vector<16x32xf32>
    %52 = arith.addf %49, %51 : vector<16x32xf32>
    %c0_32 = arith.constant 0 : index
    %c2 = arith.constant 2 : index
    %c0_33 = arith.constant 0 : index
    %c0_34 = arith.constant 0 : index
    %53 = vector.load %arg5[%c0_32, %c2, %c0_33, %c0_34] : memref<1x5x32x32xf32, #tpu.memory_space<vmem>>, vector<1x1x32x32xf32>
    %54 = vector.shape_cast %53 : vector<1x1x32x32xf32> to vector<32x32xf32>
    %cst_35 = arith.constant dense<0.000000e+00> : vector<16x32xf32>
    %55 = tpu.matmul %46, %54, %cst_35 {dimension_numbers = #tpu.dot_dimension_numbers<[1], [0], [0], [1], [0, 0, 1, 1], [], []>} : vector<16x32xf32>, vector<32x32xf32>, vector<16x32xf32> -> vector<16x32xf32>
    %56 = vector.extract_strided_slice %13 {offsets = [4, 0], sizes = [1, 32], strides = [1, 1]} : vector<12x32xf32> to vector<1x32xf32>
    %57 = vector.broadcast %56 : vector<1x32xf32> to vector<16x32xf32>
    %58 = arith.addf %55, %57 : vector<16x32xf32>
    %59 = vector.extract_strided_slice %46 {offsets = [0, 0], sizes = [1, 32], strides = [1, 1]} : vector<16x32xf32> to vector<1x32xf32>
    %60 = vector.extract_strided_slice %46 {offsets = [8, 0], sizes = [1, 32], strides = [1, 1]} : vector<16x32xf32> to vector<1x32xf32>
    %61 = tpu.concatenate %59, %60 in 0 : vector<1x32xf32>, vector<1x32xf32> -> vector<2x32xf32>
    %c0_36 = arith.constant 0 : index
    %c0_37 = arith.constant 0 : index
    %c0_38 = arith.constant 0 : index
    %c0_39 = arith.constant 0 : index
    %62 = vector.load %arg5[%c0_36, %c0_37, %c0_38, %c0_39] : memref<1x5x32x32xf32, #tpu.memory_space<vmem>>, vector<1x1x32x32xf32>
    %63 = vector.shape_cast %62 : vector<1x1x32x32xf32> to vector<32x32xf32>
    %cst_40 = arith.constant dense<0.000000e+00> : vector<2x32xf32>
    %64 = tpu.matmul %61, %63, %cst_40 {dimension_numbers = #tpu.dot_dimension_numbers<[1], [0], [0], [1], [0, 0, 1, 1], [], []>} : vector<2x32xf32>, vector<32x32xf32>, vector<2x32xf32> -> vector<2x32xf32>
    %65 = vector.extract_strided_slice %13 {offsets = [2, 0], sizes = [1, 32], strides = [1, 1]} : vector<12x32xf32> to vector<1x32xf32>
    %66 = vector.broadcast %65 : vector<1x32xf32> to vector<2x32xf32>
    %67 = arith.addf %64, %66 : vector<2x32xf32>
    %cst_41 = arith.constant 3.200000e+01 : f32
    %68 = math.sqrt %cst_41 : f32
    %cst_42 = arith.constant 1.000000e+00 : f32
    %69 = arith.divf %cst_42, %68 : f32
    "tpu.trace_start"() <{level = 10 : i32, message = "bh,kh->bk"}> : () -> ()
    %cst_43 = arith.constant dense<0.000000e+00> : vector<2x16xf32>
    %70 = tpu.matmul %67, %52, %cst_43 {dimension_numbers = #tpu.dot_dimension_numbers<[1], [1], [0], [0], [0, 0, 1, 0], [], []>} : vector<2x32xf32>, vector<16x32xf32>, vector<2x16xf32> -> vector<2x16xf32>
    "tpu.trace_stop"() : () -> ()
    %71 = vector.broadcast %69 : f32 to vector<2x16xf32>
    %72 = arith.mulf %70, %71 : vector<2x16xf32>
    %cst_44 = arith.constant 1.000000e+00 : f32
    %73 = vector.broadcast %cst_44 : f32 to vector<2x16xf32>
    %74 = arith.subf %73, %3 : vector<2x16xf32>
    %cst_45 = arith.constant -1.000000e+09 : f32
    %75 = vector.broadcast %cst_45 : f32 to vector<2x16xf32>
    %76 = arith.mulf %74, %75 : vector<2x16xf32>
    %77 = arith.addf %72, %76 : vector<2x16xf32>
    %cst_46 = arith.constant dense<0xFF800000> : vector<2xf32>
    %78 = vector.multi_reduction <maximumf>, %77, %cst_46 [1] : vector<2x16xf32> to vector<2xf32>
    %79 = vector.shape_cast %78 : vector<2xf32> to vector<2x1xf32>
    %80 = vector.broadcast %79 : vector<2x1xf32> to vector<2x16xf32>
    %81 = arith.subf %77, %80 : vector<2x16xf32>
    %82 = math.exp %81 : vector<2x16xf32>
    %cst_47 = arith.constant dense<0.000000e+00> : vector<2xf32>
    %83 = vector.multi_reduction <add>, %82, %cst_47 [1] : vector<2x16xf32> to vector<2xf32>
    %84 = vector.shape_cast %83 : vector<2xf32> to vector<2x1xf32>
    %85 = tpu.reciprocal %84 {approx = true} : vector<2x1xf32> -> vector<2x1xf32>
    %86 = vector.broadcast %85 : vector<2x1xf32> to vector<2x16xf32>
    %87 = arith.mulf %82, %86 : vector<2x16xf32>
    %cst_48 = arith.constant dense<0.000000e+00> : vector<2x32xf32>
    %88 = tpu.matmul %87, %58, %cst_48 {dimension_numbers = #tpu.dot_dimension_numbers<[1], [0], [0], [1], [0, 0, 1, 1], [], []>} : vector<2x16xf32>, vector<16x32xf32>, vector<2x32xf32> -> vector<2x32xf32>
    %c0_49 = arith.constant 0 : index
    %c3 = arith.constant 3 : index
    %c0_50 = arith.constant 0 : index
    %c0_51 = arith.constant 0 : index
    %89 = vector.load %arg5[%c0_49, %c3, %c0_50, %c0_51] : memref<1x5x32x32xf32, #tpu.memory_space<vmem>>, vector<1x1x32x32xf32>
    %90 = vector.shape_cast %89 : vector<1x1x32x32xf32> to vector<32x32xf32>
    %cst_52 = arith.constant dense<0.000000e+00> : vector<2x32xf32>
    %91 = tpu.matmul %88, %90, %cst_52 {dimension_numbers = #tpu.dot_dimension_numbers<[1], [0], [0], [1], [0, 0, 1, 1], [], []>} : vector<2x32xf32>, vector<32x32xf32>, vector<2x32xf32> -> vector<2x32xf32>
    %92 = vector.extract_strided_slice %13 {offsets = [5, 0], sizes = [1, 32], strides = [1, 1]} : vector<12x32xf32> to vector<1x32xf32>
    %93 = vector.broadcast %92 : vector<1x32xf32> to vector<2x32xf32>
    %94 = arith.addf %91, %93 : vector<2x32xf32>
    %95 = arith.addf %61, %94 : vector<2x32xf32>
    %96 = vector.extract_strided_slice %13 {offsets = [6, 0], sizes = [1, 32], strides = [1, 1]} : vector<12x32xf32> to vector<1x32xf32>
    %97 = vector.extract_strided_slice %13 {offsets = [7, 0], sizes = [1, 32], strides = [1, 1]} : vector<12x32xf32> to vector<1x32xf32>
    %cst_53 = arith.constant dense<0.000000e+00> : vector<2xf32>
    %98 = vector.multi_reduction <add>, %95, %cst_53 [1] : vector<2x32xf32> to vector<2xf32>
    %99 = vector.shape_cast %98 : vector<2xf32> to vector<2x1xf32>
    %cst_54 = arith.constant 3.200000e+01 : f32
    %100 = vector.broadcast %cst_54 : f32 to vector<2x1xf32>
    %101 = arith.divf %99, %100 : vector<2x1xf32>
    %102 = vector.broadcast %101 : vector<2x1xf32> to vector<2x32xf32>
    %103 = arith.subf %95, %102 : vector<2x32xf32>
    %104 = arith.mulf %103, %103 : vector<2x32xf32>
    %cst_55 = arith.constant dense<0.000000e+00> : vector<2xf32>
    %105 = vector.multi_reduction <add>, %104, %cst_55 [1] : vector<2x32xf32> to vector<2xf32>
    %106 = vector.shape_cast %105 : vector<2xf32> to vector<2x1xf32>
    %cst_56 = arith.constant 3.200000e+01 : f32
    %107 = vector.broadcast %cst_56 : f32 to vector<2x1xf32>
    %108 = arith.divf %106, %107 : vector<2x1xf32>
    %109 = vector.broadcast %101 : vector<2x1xf32> to vector<2x32xf32>
    %110 = arith.subf %95, %109 : vector<2x32xf32>
    %cst_57 = arith.constant 9.99999996E-13 : f32
    %111 = vector.broadcast %cst_57 : f32 to vector<2x1xf32>
    %112 = arith.addf %108, %111 : vector<2x1xf32>
    %113 = math.rsqrt %112 : vector<2x1xf32>
    %114 = vector.broadcast %113 : vector<2x1xf32> to vector<2x32xf32>
    %115 = arith.mulf %110, %114 : vector<2x32xf32>
    %116 = vector.broadcast %96 : vector<1x32xf32> to vector<2x32xf32>
    %117 = arith.mulf %115, %116 : vector<2x32xf32>
    %118 = vector.broadcast %97 : vector<1x32xf32> to vector<2x32xf32>
    %119 = arith.addf %117, %118 : vector<2x32xf32>
    %cst_58 = arith.constant dense<0.000000e+00> : vector<2x64xf32>
    %120 = tpu.matmul %119, %9, %cst_58 {dimension_numbers = #tpu.dot_dimension_numbers<[1], [0], [0], [1], [0, 0, 1, 1], [], []>} : vector<2x32xf32>, vector<32x64xf32>, vector<2x64xf32> -> vector<2x64xf32>
    %121 = vector.broadcast %15 : vector<1x64xf32> to vector<2x64xf32>
    %122 = arith.addf %120, %121 : vector<2x64xf32>
    %123 = arith.mulf %122, %122 : vector<2x64xf32>
    %124 = arith.mulf %122, %123 : vector<2x64xf32>
    %cst_59 = arith.constant 4.471500e-02 : f32
    %125 = vector.broadcast %cst_59 : f32 to vector<2x64xf32>
    %126 = arith.mulf %125, %124 : vector<2x64xf32>
    %127 = arith.addf %122, %126 : vector<2x64xf32>
    %cst_60 = arith.constant 0.797884583 : f32
    %128 = vector.broadcast %cst_60 : f32 to vector<2x64xf32>
    %129 = arith.mulf %128, %127 : vector<2x64xf32>
    %130 = math.tanh %129 : vector<2x64xf32>
    %cst_61 = arith.constant 1.000000e+00 : f32
    %131 = vector.broadcast %cst_61 : f32 to vector<2x64xf32>
    %132 = arith.addf %131, %130 : vector<2x64xf32>
    %cst_62 = arith.constant 5.000000e-01 : f32
    %133 = vector.broadcast %cst_62 : f32 to vector<2x64xf32>
    %134 = arith.mulf %133, %132 : vector<2x64xf32>
    %135 = arith.mulf %122, %134 : vector<2x64xf32>
    %cst_63 = arith.constant dense<0.000000e+00> : vector<2x32xf32>
    %136 = tpu.matmul %135, %11, %cst_63 {dimension_numbers = #tpu.dot_dimension_numbers<[1], [0], [0], [1], [0, 0, 1, 1], [], []>} : vector<2x64xf32>, vector<64x32xf32>, vector<2x32xf32> -> vector<2x32xf32>
    %137 = vector.extract_strided_slice %13 {offsets = [8, 0], sizes = [1, 32], strides = [1, 1]} : vector<12x32xf32> to vector<1x32xf32>
    %138 = vector.broadcast %137 : vector<1x32xf32> to vector<2x32xf32>
    %139 = arith.addf %136, %138 : vector<2x32xf32>
    %140 = arith.addf %119, %139 : vector<2x32xf32>
    %141 = vector.extract_strided_slice %13 {offsets = [9, 0], sizes = [1, 32], strides = [1, 1]} : vector<12x32xf32> to vector<1x32xf32>
    %142 = vector.extract_strided_slice %13 {offsets = [10, 0], sizes = [1, 32], strides = [1, 1]} : vector<12x32xf32> to vector<1x32xf32>
    %cst_64 = arith.constant dense<0.000000e+00> : vector<2xf32>
    %143 = vector.multi_reduction <add>, %140, %cst_64 [1] : vector<2x32xf32> to vector<2xf32>
    %144 = vector.shape_cast %143 : vector<2xf32> to vector<2x1xf32>
    %cst_65 = arith.constant 3.200000e+01 : f32
    %145 = vector.broadcast %cst_65 : f32 to vector<2x1xf32>
    %146 = arith.divf %144, %145 : vector<2x1xf32>
    %147 = vector.broadcast %146 : vector<2x1xf32> to vector<2x32xf32>
    %148 = arith.subf %140, %147 : vector<2x32xf32>
    %149 = arith.mulf %148, %148 : vector<2x32xf32>
    %cst_66 = arith.constant dense<0.000000e+00> : vector<2xf32>
    %150 = vector.multi_reduction <add>, %149, %cst_66 [1] : vector<2x32xf32> to vector<2xf32>
    %151 = vector.shape_cast %150 : vector<2xf32> to vector<2x1xf32>
    %cst_67 = arith.constant 3.200000e+01 : f32
    %152 = vector.broadcast %cst_67 : f32 to vector<2x1xf32>
    %153 = arith.divf %151, %152 : vector<2x1xf32>
    %154 = vector.broadcast %146 : vector<2x1xf32> to vector<2x32xf32>
    %155 = arith.subf %140, %154 : vector<2x32xf32>
    %cst_68 = arith.constant 9.99999996E-13 : f32
    %156 = vector.broadcast %cst_68 : f32 to vector<2x1xf32>
    %157 = arith.addf %153, %156 : vector<2x1xf32>
    %158 = math.rsqrt %157 : vector<2x1xf32>
    %159 = vector.broadcast %158 : vector<2x1xf32> to vector<2x32xf32>
    %160 = arith.mulf %155, %159 : vector<2x32xf32>
    %161 = vector.broadcast %141 : vector<1x32xf32> to vector<2x32xf32>
    %162 = arith.mulf %160, %161 : vector<2x32xf32>
    %163 = vector.broadcast %142 : vector<1x32xf32> to vector<2x32xf32>
    %164 = arith.addf %162, %163 : vector<2x32xf32>
    %c0_69 = arith.constant 0 : index
    %c4 = arith.constant 4 : index
    %c0_70 = arith.constant 0 : index
    %c0_71 = arith.constant 0 : index
    %165 = vector.load %arg5[%c0_69, %c4, %c0_70, %c0_71] : memref<1x5x32x32xf32, #tpu.memory_space<vmem>>, vector<1x1x32x32xf32>
    %166 = vector.shape_cast %165 : vector<1x1x32x32xf32> to vector<32x32xf32>
    %cst_72 = arith.constant dense<0.000000e+00> : vector<2x32xf32>
    %167 = tpu.matmul %164, %166, %cst_72 {dimension_numbers = #tpu.dot_dimension_numbers<[1], [0], [0], [1], [0, 0, 1, 1], [], []>} : vector<2x32xf32>, vector<32x32xf32>, vector<2x32xf32> -> vector<2x32xf32>
    %168 = vector.extract_strided_slice %13 {offsets = [11, 0], sizes = [1, 32], strides = [1, 1]} : vector<12x32xf32> to vector<1x32xf32>
    %169 = vector.broadcast %168 : vector<1x32xf32> to vector<2x32xf32>
    %170 = arith.addf %167, %169 : vector<2x32xf32>
    %171 = math.tanh %170 : vector<2x32xf32>
    %cst_73 = arith.constant 0.000000e+00 : f32
    %172 = vector.broadcast %cst_73 : f32 to vector<2x96xf32>
    %173 = tpu.concatenate %171, %172 in 1 : vector<2x32xf32>, vector<2x96xf32> -> vector<2x128xf32>
    %c0_74 = arith.constant 0 : index
    %c0_75 = arith.constant 0 : index
    %c0_76 = arith.constant 0 : index
    %174 = vector.load %arg10[%c0_74, %c0_75, %c0_76] : memref<1x2x128xf32, #tpu.memory_space<vmem>>, vector<1x2x128xf32>
    %175 = vector.shape_cast %174 : vector<1x2x128xf32> to vector<2x128xf32>
    %176 = vector.shape_cast %173 : vector<2x128xf32> to vector<1x2x128xf32>
    tpu.vector_store %arg10[%c0_74, %c0_75, %c0_76], %176 {strides = array<i32>} : memref<1x2x128xf32, #tpu.memory_space<vmem>>, vector<1x2x128xf32>,
    return
  }
  func.func @transform_0(%arg0: i32) -> (i32, i32, i32) {
    %c0_i32 = arith.constant 0 : i32
    %c0_i32_0 = arith.constant 0 : i32
    %c0_i32_1 = arith.constant 0 : i32
    return %arg0, %c0_i32, %c0_i32_0 : i32, i32, i32
  }
  func.func @transform_1(%arg0: i32) -> (i32, i32, i32) {
    %c0_i32 = arith.constant 0 : i32
    %c0_i32_0 = arith.constant 0 : i32
    %c0_i32_1 = arith.constant 0 : i32
    return %arg0, %c0_i32, %c0_i32_0 : i32, i32, i32
  }
  func.func @transform_2(%arg0: i32) -> (i32, i32, i32) {
    %c0_i32 = arith.constant 0 : i32
    %c0_i32_0 = arith.constant 0 : i32
    %c0_i32_1 = arith.constant 0 : i32
    return %arg0, %c0_i32, %c0_i32_0 : i32, i32, i32
  }
  func.func @transform_3(%arg0: i32) -> (i32, i32, i32) {
    %c0_i32 = arith.constant 0 : i32
    %c0_i32_0 = arith.constant 0 : i32
    %c0_i32_1 = arith.constant 0 : i32
    return %arg0, %c0_i32, %c0_i32_0 : i32, i32, i32
  }
  func.func @transform_4(%arg0: i32) -> (i32, i32, i32, i32) {
    %c0_i32 = arith.constant 0 : i32
    %c0_i32_0 = arith.constant 0 : i32
    %c0_i32_1 = arith.constant 0 : i32
    %c0_i32_2 = arith.constant 0 : i32
    return %arg0, %c0_i32, %c0_i32_0, %c0_i32_1 : i32, i32, i32, i32
  }
  func.func @transform_5(%arg0: i32) -> (i32, i32, i32) {
    %c0_i32 = arith.constant 0 : i32
    %c0_i32_0 = arith.constant 0 : i32
    %c0_i32_1 = arith.constant 0 : i32
    return %arg0, %c0_i32, %c0_i32_0 : i32, i32, i32
  }
  func.func @transform_6(%arg0: i32) -> (i32, i32, i32) {
    %c0_i32 = arith.constant 0 : i32
    %c0_i32_0 = arith.constant 0 : i32
    %c0_i32_1 = arith.constant 0 : i32
    return %arg0, %c0_i32, %c0_i32_0 : i32, i32, i32
  }
  func.func @transform_7(%arg0: i32) -> (i32, i32, i32) {
    %c0_i32 = arith.constant 0 : i32
    %c0_i32_0 = arith.constant 0 : i32
    %c0_i32_1 = arith.constant 0 : i32
    return %arg0, %c0_i32, %c0_i32_0 : i32, i32, i32
  }
  func.func @transform_8(%arg0: i32) -> (i32, i32, i32) {
    %c0_i32 = arith.constant 0 : i32
    %c0_i32_0 = arith.constant 0 : i32
    %c0_i32_1 = arith.constant 0 : i32
    return %arg0, %c0_i32, %c0_i32_0 : i32, i32, i32
  }
  func.func @transform_9(%arg0: i32) -> (i32, i32, i32) {
    %c0_i32 = arith.constant 0 : i32
    %c0_i32_0 = arith.constant 0 : i32
    %c0_i32_1 = arith.constant 0 : i32
    return %arg0, %c0_i32, %c0_i32_0 : i32, i32, i32
  }
}

</mosaic_0001>

<bundles_post_ra>
// kernel: dual_encoder_forward.1
= control target key start
LH: loop header
LB: loop body
LE: loop exit
PB: predicated region body
PF: predicated region fallthrough
CT: control target
= control target key end

     0   :  { %s2002_s30 = smov 0   ;;  %s2179_s0 = inlined_call_operand.vmem [shape: s32[2,16,1], index: 0, kind: input, shape index: {}]   ;;  %s2180_s1 = inlined_call_operand.vmem [shape: f32[2,2,16], index: 1, kind: input, shape index: {}]   ;;  %s2181_s2 = inlined_call_operand.vmem [shape: f32[2,50,32], index: 2, kind: input, shape index: {}]   ;;  %s2182_s3 = inlined_call_operand.vmem [shape: f32[2,16,32], index: 3, kind: input, shape index: {}]   ;;  %s2183_s4 = inlined_call_operand.vmem [shape: f32[2,5,32,32], index: 4, kind: input, shape index: {}]   ;;  %s2184_s5 = inlined_call_operand.vmem [shape: f32[2,32,64], index: 5, kind: input, shape index: {}]   ;;  %s2185_s6 = inlined_call_operand.vmem [shape: f32[2,64,32], index: 6, kind: input, shape index: {}]   ;;  %s2186_s7 = inlined_call_operand.vmem [shape: f32[2,12,32], index: 7, kind: input, shape index: {}]   ;;  %s2187_s8 = inlined_call_operand.vmem [shape: f32[2,1,64], index: 8, kind: input, shape index: {}]   ;;  %s2188_s9 = inlined_call_operand.vmem [shape: f32[2,2,128], index: 9, kind: output, shape index: {}]  }
   0x1 LB: > { %s1605_s10 = sadd.s32 4294967295, %s1946_s30   ;;  %p1609_p0 = scmp.ge.s32.totalorder %s1946_s30, 1  ;;  %s1946_s30 = sphi %s2002_s30, %s19_s30  }
   0x2   : > { %p364_p1 = scmp.lt.s32.totalorder %s1946_s30, 3 }
   0x4   : > { %p365_p2 = pnand %p1609_p0, %p364_p1 }
   0x5   : > { %p436_p3 = scmp.lt.s32.totalorder (!%p365_p2), %s1605_s10, 1  ;;  %v1948_v0 = vmov (!%p365_p2), 0   ;;  %vm530_vm0 = vcmask (!%p365_p2), 1041408   ;;  %v509_v13 = vlaneseq (!%p365_p2)  ;;  %vm523_vm1 = vcmask (!%p365_p2), 408576  }
   0x6   : > { %368 = sbr.rel (%p365_p2) target bundleno = 3175 (0xc67), region = 56  ;;  %1923 = vset.pattern.permute.xlu0 (!%p365_p2), %v1948_v0  ;;  %v1949_v16 = vmov (!%p365_p2), 0.0   ;;  %vm609_vm4 = vcmask (!%p365_p2), 261120   ;;  %v1950_v43 = vmov (!%p365_p2), 0.0|0.0   ;;  %vm1951_vm5 = vmmov (!%p365_p2), 0  }
   0x7   : > { %v510_v14 = vand.u32 (!%p365_p2), 127, %v509_v13  ;;  %v2056_v59 = vshrl.u32 (!%p365_p2), %v509_v13, 7  ;;  %vm825_vm6 = vcmask (!%p365_p2), 1040384   ;;  %vm1874_vm7 = vmpackc.low (!%p365_p2), %vm609_vm4, %vm609_vm4  ;;  %vm991_vm8 = vcmask (!%p365_p2), 123904  }
   0x8   : > { %vm1003_vm9 = vcmask (!%p365_p2), 130048   ;;  %vm1160_vm10 = vcmask (!%p365_p2), 254976   ;;  %vm1276_vm11 = vcmask (!%p365_p2), 523264  }
   0x9   : > { %v639_v61 = vsub.s32 (!%p365_p2), 0, %v2056_v59  ;;  %v645_v63 = vsub.s32 (!%p365_p2), 1, %v2056_v59 }
   0xd   : > { %s2190_s10 = smov (!%p436_p3, %s1605_s10), 1 }
   0xe   : > { %s2013_s11 = sshll.u32 %s2190_s10, 4  ;;  %s1909_s15 = smul.u32 56, %s2190_s10 }
   0xf   : > { %s440_s14 = scalar_lea.vmem %s2179_s0, %s2013_s11  ;;  %s454_s21 = scalar_lea.vmem %s2182_s3, %s2013_s11 }
  0x10   : > { %v482_v1 = vld [vmem:[%s440_s14] sm:$0xff]  ;;  %v483_v2 = vld [vmem:[%s440_s14 + $0x8] sm:$0xff]  ;;  %s449_s18 = scalar_lea.vmem %s2181_s2, %s1909_s15  ;;  %s1910_s22 = smul.u32 160, %s2190_s10 }
  0x11   : > { %512 = vperm.xlu0 %1923, %v482_v1   ;;  %v485_v3 = vld [vmem:[%s449_s18] sm:$0xff]  ;;  %v486_v4 = vld [vmem:[%s449_s18 + $0x8] sm:$0xff]  ;;  %v487_v5 = vld [vmem:[%s449_s18 + $0x10] sm:$0xff]  ;;  %s2062_s28 = scalar_lea.vmem %s2186_s7, %s2013_s11  ;;  %s1612_s29 = sshll.u32 %s2190_s10, 1 }
  0x12   : > { %v1838_v6 = vpack.c.bf16 %v486_v4, %v485_v3  ;;  %v488_v7 = vld [vmem:[%s449_s18 + $0x18] sm:$0xff]  ;;  %v489_v9 = vld [vmem:[%s449_s18 + $0x20] sm:$0xff]  ;;  %v490_v10 = vld [vmem:[%s449_s18 + $0x28] sm:$0xff]  ;;  %s2038_s25 = scalar_lea.vmem %s2183_s4, %s1910_s22  ;;  %s444_s13 = scalar_lea.vmem %s2180_s1, %s1612_s29 }
  0x13   : > { %v1842_v8 = vpack.c.bf16 %v488_v7, %v487_v5  ;;  %v1846_v11 = vpack.c.bf16 %v490_v10, %v489_v9  ;;  %v491_v12 = vld [vmem:[%s449_s18 + $0x30] sm:$0x3]  ;;  %v493_v20 = vld [vmem:[%s454_s21 + $0x8] sm:$0xff]  ;;  %v492_v21 = vld [vmem:[%s454_s21] sm:$0xff]  ;;  %s1663_s14 = sshll.u32 %s2190_s10, 5  ;;  %s1664_s18 = sshll.u32 %s2190_s10, 6 }
  0x14   : > { %1839 = vmatprep.subr.bf16.mxu0 %v1838_v6  ;;  %v1629_v38 = vld [vmem:[%s2038_s25 + $0x20] sm:$0xff]  ;;  %v1630_v39 = vld [vmem:[%s2038_s25 + $0x28] sm:$0xff]  ;;  %v1631_v40 = vld [vmem:[%s2038_s25 + $0x30] sm:$0xff]  ;;  %s464_s17 = scalar_lea.vmem %s2184_s5, %s1663_s14  ;;  %s469_s21 = scalar_lea.vmem %s2185_s6, %s1664_s18 }
  0x15   : > { %515 = vperm.xlu0 %1923, %v483_v2   ;;  %1841 = vmatpush3.bf16.msra.mxu0 %v1838_v6  ;;  %v1850_v41 = vpack.c.bf16 %v1630_v39, %v1629_v38  ;;  %v1632_v42 = vld [vmem:[%s2038_s25 + $0x38] sm:$0xff]  ;;  %v827_v45 = vld [vmem:[%s2038_s25] sm:$0xff]  ;;  %v828_v46 = vld [vmem:[%s2038_s25 + $0x8] sm:$0xff]  ;;  %s477_s24 = scalar_lea.vmem %s2187_s8, %s2190_s10  ;;  %s481_s27 = scalar_lea.vmem %s2188_s9, %s1612_s29 }
  0x16   : > { %1843 = vmatprep.subr.bf16.mxu0 %v1842_v8  ;;  %v1854_v44 = vpack.c.bf16 %v1632_v42, %v1631_v40  ;;  %v1867_v47 = vpack.c.bf16 %v828_v46, %v827_v45  ;;  %v1635_v48 = vld [vmem:[%s2038_s25 + $0x40] sm:$0xff]  ;;  %v1636_v49 = vld [vmem:[%s2038_s25 + $0x48] sm:$0xff]  ;;  %v829_v51 = vld [vmem:[%s2038_s25 + $0x10] sm:$0xff] }
  0x17   : > { %1851 = vmatprep.subr.bf16.mxu1 %v1850_v41  ;;  %v1858_v50 = vpack.c.bf16 %v1636_v49, %v1635_v48  ;;  %v830_v52 = vld [vmem:[%s2038_s25 + $0x18] sm:$0xff]  ;;  %v2066_v62 = vld [vmem:[%s2062_s28] sm:$0xff] }
  0x18   : > { %1853 = vmatpush3.bf16.msra.mxu1 %v1850_v41  ;;  %v1870_v53 = vpack.c.bf16 %v830_v52, %v829_v51  ;;  %v640_v0 = vrot.slane %v2066_v62, %v639_v61  ;;  %v646_v3 = vrot.slane %v2066_v62, %v645_v63  ;;  %v1638_v9 = vld [vmem:[%s2038_s25 + $0x58] sm:$0xff]  ;;  %v1646_v49 = vld [vmem:[%s2038_s25 + $0x60] sm:$0xff]  ;;  %v1648_v51 = vld [vmem:[%s2038_s25 + $0x70] sm:$0xff] }
  0x19   : > { %1845 = vmatpush3.bf16.msra.mxu0 %v1842_v8  ;;  %1855 = vmatprep.subr.bf16.mxu1 %v1854_v44  ;;  %v1637_v8 = vld [vmem:[%s2038_s25 + $0x50] sm:$0xff] }
  0x1a   : > { %1847 = vmatprep.subr.bf16.mxu0 %v1846_v11 }
  0x1c   : > { %1857 = vmatpush3.bf16.msra.mxu1 %v1854_v44 }
  0x1d   : > { %1849 = vmatpush3.bf16.msra.mxu0 %v1846_v11  ;;  %1859 = vmatprep.subr.bf16.mxu1 %v1858_v50 }
  0x1e   : > { %1734 = vmatprep.subr.msk.mxu0 %vm530_vm0, %v491_v12 }
  0x21   : > { %1735 = vmatpush3.msk.msra.mxu0 %vm530_vm0, %v491_v12  ;;  %v1862_v12 = vpack.c.bf16 %v1638_v9, %v1637_v8 }
  0x22   : > { %1866 = vmatprep.subr.bf16.mxu0 %v1950_v43 }
  0x90   : > { %v513_v15 = vpop.permute.xlu0 %512 }
  0x91   : > { %vm517_vm2 = vcmp.eq.s32.totalorder %v513_v15, %v510_v14  ;;  %v656_v15 = vsub.s32 3, %v2056_v59 }
  0x92   : > { %v1624_v17 = vsel %vm517_vm2, 1.0, %v1949_v16 }
  0x93   : > { %1736 = vmatprep.mubr.msk.f32.mxu0 %vm523_vm1, %v1624_v17  ;;  %v657_v17 = vrot.slane %v2066_v62, %v656_v15 }
  0x94   : > { %v516_v18 = vpop.permute.xlu0 %515 }
  0x95   : > { %vm518_vm3 = vcmp.eq.s32.totalorder %v516_v18, %v510_v14 }
  0x96   : > { %v1625_v19 = vsel %vm518_vm3, 1.0, %v1949_v16 }
  0x97   : > { %1737 = vmatmul.mubr.msk.f32.vlgmr.msra.gmra.mrb[0].mxu0 %vm523_vm1, %v1625_v19 }
  0x98   : > { %1868 = vmatpush3.bf16.msra.mxu0 %v1867_v47  ;;  %1769 = vmatprep.mubr.msk.f32.mxu0 %vm1951_vm5, %v1949_v16 }
  0x99   : > { %1869 = vmatprep.subr.bf16.mxu0 %v1950_v43 }
  0x9c   : > { %1871 = vmatpush3.bf16.msra.mxu0 %v1870_v53  ;;  %v1649_v53 = vld [vmem:[%s2038_s25 + $0x78] sm:$0xff] }
  0x9d   : > { %1876 = vmatprep.subr.bf16.mxu0 %v1950_v43 }
 0x16a   : > { %v1738_v22 = vpop.f32.mrb[0].mxu0 }
 0x16b   : > { %v606_v23 = vadd.f32 %v1738_v22, %v493_v20  ;;  %v600_v24 = vpop.f32.mrb[1].mxu0 }
 0x16c   : > { %v601_v25 = vadd.f32 %v600_v24, %v492_v21  ;;  %v746_v21 = vsub.s32 4, %v2056_v59 }
 0x16d   : > { %v613_v27 = vsel %vm609_vm4, %v606_v23, 0.0 }
 0x16e   : > { %v610_v26 = vsel %vm609_vm4, %v601_v25, 0.0 }
 0x16f   : > { %611 = vadd.xlane.f32.xlu1 %v610_v26 }
 0x173   : > { %614 = vadd.xlane.f32.xlu1 %v613_v27  ;;  %v747_v27 = vrot.slane %v2066_v62, %v746_v21 }
 0x1fc   : > { %v612_v28 = vpop.xlane.xlu1 %611 }
 0x1fd   : > { %v617_v29 = vmul.f32 0.03125, %v612_v28 }
 0x1ff   : > { %v619_v30 = vsub.f32 %v601_v25, %v617_v29 }
 0x200   : > { %v615_v31 = vpop.xlane.xlu1 %614 }
 0x201   : > { %v618_v32 = vmul.f32 0.03125, %v615_v31  ;;  %v621_v33 = vmul.f32 %v619_v30, %v619_v30 }
 0x203   : > { %v620_v34 = vsub.f32 %v606_v23, %v618_v32  ;;  %v623_v35 = vsel %vm609_vm4, %v621_v33, 0.0  ;;  %v833_v23 = vsub.s32 2, %v2056_v59 }
 0x204   : > { %624 = vadd.xlane.f32.xlu0 %v623_v35  ;;  %v484_v35 = vld [vmem:[%s444_s13] sm:$0x3] }
 0x205   : > { %v622_v36 = vmul.f32 %v620_v34, %v620_v34  ;;  %v834_v28 = vrot.slane %v2066_v62, %v833_v23 }
 0x207   : > { %v626_v37 = vsel %vm609_vm4, %v622_v36, 0.0  ;;  %v988_v36 = vsub.f32 1.0, %v484_v35  ;;  %v501_v35 = vld [vmem:[%s469_s21 + $0x18] sm:$0xff] }
 0x208   : > { %627 = vadd.xlane.f32.xlu1 %v626_v37 }
 0x209   : > { %v989_v37 = vmul.f32 -1e+09, %v988_v36 }
 0x291   : > { %v625_v54 = vpop.xlane.xlu0 %624 }
 0x292   : > { %v629_v55 = vmul.f32 0.03125, %v625_v54  ;;  %v1883_v54 = vpack.c.bf16 %v1649_v53, %v1648_v51 }
 0x294   : > { %v631_v56 = vadd.f32 1e-12, %v629_v55 }
 0x295   : > { %v628_v57 = vpop.xlane.xlu1 %627 }
 0x296   : > { %1924 = vrsqrt.f32 %v631_v56  ;;  %v630_v58 = vmul.f32 0.03125, %v628_v57 }
 0x298   : > { %v632_v60 = vadd.f32 1e-12, %v630_v58 }
 0x29a   : > { %1926 = vrsqrt.f32 %v632_v60 }
 0x2a0   : > { %v1925_v1 = vpop.eup %1924 }
 0x2a1   : > { %v635_v2 = vmul.f32 %v1925_v1, %v619_v30 }
 0x2a3   : > { %v641_v4 = vmul.f32 %v640_v0, %v635_v2 }
 0x2a4   : > { %v1927_v5 = vpop.eup %1926 }
 0x2a5   : > { %v647_v6 = vadd.f32 %v646_v3, %v641_v4  ;;  %v636_v7 = vmul.f32 %v1927_v5, %v620_v34 }
 0x2a7   : > { %1747 = vmatprep.mubr.msk.f32.mxu1 %vm609_vm4, %v647_v6  ;;  %v642_v10 = vmul.f32 %v640_v0, %v636_v7  ;;  %v1084_v0 = vsub.s32 5, %v2056_v59 }
 0x2a9   : > { %v648_v11 = vadd.f32 %v646_v3, %v642_v10  ;;  %v1085_v1 = vrot.slane %v2066_v62, %v1084_v0 }
 0x2ab   : > { %1748 = vmatmul.mubr.msk.f32.vlgmr.msra.gmra.mrb[0].mxu1 %vm609_vm4, %v648_v11  ;;  %v823_v13 = vrot.slane %v648_v11, 7 }
 0x2ac   : > { %1861 = vmatpush3.bf16.msra.mxu1 %v1858_v50  ;;  %1758 = vmatprep.mubr.msk.f32.mxu1 %vm609_vm4, %v647_v6  ;;  %v1647_v50 = vld [vmem:[%s2038_s25 + $0x68] sm:$0xff] }
 0x2ad   : > { %1863 = vmatprep.subr.bf16.mxu1 %v1862_v12  ;;  %v2080_v14 = vsel %vm825_vm6, %v647_v6, %v823_v13  ;;  %v1880_v52 = vpack.c.bf16 %v1647_v50, %v1646_v49  ;;  %v495_v13 = vld [vmem:[%s464_s17 + $0x8] sm:$0xff] }
 0x2ae   : > { %1770 = vmatmul.mubr.msk.f32.vlgmr.msra.gmra.mrb[2].mxu0 %vm609_vm4, %v2080_v14 }
 0x2af   : > { %1783 = vmatprep.mubr.msk.f32.mxu0 %vm1951_vm5, %v1949_v16 }
 0x2b0   : > { %1865 = vmatpush3.bf16.msra.mxu1 %v1862_v12  ;;  %v494_v12 = vld [vmem:[%s464_s17] sm:$0xff] }
 0x2b1   : > { %1872 = vmatprep.subr.bf16.mxu1 %v1950_v43 }
 0x2b3   : > { %1759 = vmatmul.mubr.msk.f32.vlgmr.msra.gmra.mrb[2].mxu1 %vm609_vm4, %v648_v11 }
 0x2b4   : > { %1776 = vmatprep.mubr.msk.f32.mxu1 %vm1951_vm5, %v1949_v16 }
 0x37e   : > { %v1749_v18 = vpop.f32.mrb[0].mxu1 }
 0x37f   : > { %v736_v19 = vadd.f32 %v1749_v18, %v657_v17  ;;  %v730_v20 = vpop.f32.mrb[1].mxu1  ;;  %v497_v18 = vld [vmem:[%s464_s17 + $0x18] sm:$0xff] }
 0x380   : > { %v731_v22 = vadd.f32 %v730_v20, %v657_v17  ;;  %v1886_v17 = vpack.c.bf16 %v495_v13, %v494_v12 }
 0x381   : > { %v904_v24 = vpop.f32.mrb[2].mxu0 }
 0x382   : > { %v1873_v25 = vpack.c.bf16 %v736_v19, %v731_v22  ;;  %v1771_v26 = vpop.f32.mrb[3].mxu0  ;;  %v905_v33 = vadd.f32 %v904_v24, %v834_v28  ;;  %v1176_v24 = vsub.s32 6, %v2056_v59 }
 0x384   : > { %1875 = vmatpush3.bf16.xpose.msk.msra.mxu1 %vm1874_vm7, %v1873_v25  ;;  %v1181_v25 = vsub.s32 7, %v2056_v59  ;;  %v1177_v26 = vrot.slane %v2066_v62, %v1176_v24 }
 0x385   : > { %1879 = vmatprep.subr.bf16.mxu1 %v1950_v43 }
 0x386   : > { %v1760_v29 = vpop.f32.mrb[2].mxu1 }
 0x387   : > { %v820_v30 = vadd.f32 %v1760_v29, %v747_v27  ;;  %v814_v31 = vpop.f32.mrb[3].mxu1  ;;  %v1182_v29 = vrot.slane %v2066_v62, %v1181_v25  ;;  %v500_v62 = vld [vmem:[%s469_s21 + $0x10] sm:$0xff] }
 0x388   : > { %v815_v32 = vadd.f32 %v814_v31, %v747_v27  ;;  %v1895_v36 = vpack.c.bf16 %v501_v35, %v500_v62 }
 0x38a   : > { %v1877_v34 = vpack.c.bf16 %v820_v30, %v815_v32  ;;  %v498_v32 = vld [vmem:[%s469_s21] sm:$0xff] }
 0x38b   : > { %1777 = vmatmul.mubr.msk.f32.vlgmr.msra.gmra.mrb[4].mxu1 %vm609_vm4, %v905_v33  ;;  %v499_v33 = vld [vmem:[%s469_s21 + $0x8] sm:$0xff] }
 0x38c   : > { %1878 = vmatpush3.bf16.msra.mxu0 %v1877_v34  ;;  %1794 = vmatprep.mubr.msk.f32.mxu1 %vm1951_vm5, %v1949_v16  ;;  %v1892_v34 = vpack.c.bf16 %v499_v33, %v498_v32 }
 0x38d   : > { %1885 = vmatprep.subr.bf16.mxu0 %v1950_v43  ;;  %1881 = vmatpush3.bf16.msra.mxu1 %v1880_v52 }
 0x38e   : > { %1882 = vmatprep.subr.bf16.mxu1 %v1950_v43 }
 0x391   : > { %1884 = vmatpush3.bf16.msra.mxu1 %v1883_v54 }
 0x392   : > { %1891 = vmatprep.subr.bf16.mxu1 %v1950_v43 }
 0x45e   : > { %v983_v38 = vpop.f32.mrb[4].mxu1 }
 0x45f   : > { %v987_v39 = vmul.f32 0.17677669, %v983_v38  ;;  %v1778_v40 = vpop.f32.mrb[5].mxu1 }
 0x460   : > { %v505_v40 = vld [vmem:[%s469_s21 + $0x38] sm:$0xff] }
 0x461   : > { %v990_v41 = vadd.f32 %v989_v37, %v987_v39  ;;  %v502_v37 = vld [vmem:[%s469_s21 + $0x20] sm:$0xff]  ;;  %v504_v39 = vld [vmem:[%s469_s21 + $0x30] sm:$0xff] }
 0x463   : > { %v992_v42 = vsel %vm991_vm8, %v990_v41, -inf }
 0x464   : > { %993 = vmax.xlane.f32.xlu1 %v992_v42  ;;  %v1651_v42 = vld [vmem:[%s477_s24] ss:$0 sm:$0xff] }
 0x4f1   : > { %v994_v44 = vpop.xlane.xlu1 %993 }
 0x4f2   : > { %v995_v45 = vsub.f32 %v990_v41, %v994_v44  ;;  %v1901_v41 = vpack.c.bf16 %v505_v40, %v504_v39 }
 0x4f4   : > { %v996_v46 = vmul.f32 1.442695, %v995_v45 }
 0x4f6   : > { %1928 = vpow2.f32 %v996_v46 }
 0x500   : > { %v1929_v47 = vpop.eup %1928 }
 0x501   : > { %v998_v48 = vsel %vm991_vm8, %v1929_v47, 0.0 }
 0x502   : > { %999 = vadd.xlane.f32.xlu1 %v998_v48 }
 0x58f   : > { %v1000_v55 = vpop.xlane.xlu1 %999 }
 0x590   : > { %1930 = vrcp.f32 %v1000_v55 }
 0x59a   : > { %v1931_v56 = vpop.eup %1930 }
 0x59b   : > { %v1002_v57 = vmul.f32 %v1931_v56, %v1929_v47  ;;  %v507_v56 = vld [vmem:[%s2062_s28 + $0x8] sm:$0xf] }
 0x59d   : > { %1784 = vmatmul.mubr.msk.f32.vlgmr.msra.gmra.mrb[4].mxu0 %vm1003_vm9, %v1002_v57  ;;  %v1275_v57 = vrot.slane %v507_v56, %v639_v61  ;;  %v1656_v61 = vld [vmem:[%s2038_s25 + $0x90] sm:$0xff] }
 0x59e   : > { %1805 = vmatprep.mubr.msk.f32.mxu0 %vm1951_vm5, %v1949_v16  ;;  %1887 = vmatpush3.bf16.msra.mxu0 %v1886_v17 }
 0x59f   : > { %1888 = vmatprep.subr.bf16.mxu0 %v1950_v43 }
 0x670   : > { %v1073_v58 = vpop.f32.mrb[4].mxu0 }
 0x671   : > { %v1785_v60 = vpop.f32.mrb[5].mxu0  ;;  %1795 = vmatmul.mubr.msk.f32.vlgmr.msra.gmra.mrb[6].mxu1 %vm609_vm4, %v1073_v58 }
 0x672   : > { %1824 = vmatprep.mubr.msk.f32.mxu1 %vm1951_vm5, %v1949_v16  ;;  %1893 = vmatpush3.bf16.msra.mxu1 %v1892_v34 }
 0x673   : > { %1894 = vmatprep.subr.bf16.mxu1 %v1950_v43 }
 0x676   : > { %1896 = vmatpush3.bf16.msra.mxu1 %v1895_v36 }
 0x677   : > { %1897 = vmatprep.subr.bf16.mxu1 %v1950_v43 }
 0x744   : > { %v1155_v2 = vpop.f32.mrb[6].mxu1 }
 0x745   : > { %v1156_v3 = vadd.f32 %v1155_v2, %v1085_v1  ;;  %v1796_v4 = vpop.f32.mrb[7].mxu1 }
 0x747   : > { %v1159_v5 = vadd.f32 %v1156_v3, %v2080_v14  ;;  %v496_v14 = vld [vmem:[%s464_s17 + $0x10] sm:$0xff] }
 0x748   : > { %v1889_v19 = vpack.c.bf16 %v497_v18, %v496_v14  ;;  %v1367_v18 = vrot.slane %v507_v56, %v645_v63 }
 0x749   : > { %v1161_v6 = vsel %vm1160_vm10, %v1159_v5, 0.0 }
 0x74a   : > { %1162 = vadd.xlane.f32.xlu1 %v1161_v6  ;;  %1890 = vmatpush3.bf16.msra.mxu0 %v1889_v19 }
 0x74b   : > { %1903 = vmatprep.subr.bf16.mxu0 %v1950_v43 }
 0x7d7   : > { %v1163_v7 = vpop.xlane.xlu1 %1162 }
 0x7d8   : > { %v1164_v8 = vmul.f32 0.03125, %v1163_v7 }
 0x7da   : > { %v1165_v9 = vsub.f32 %v1159_v5, %v1164_v8  ;;  %v1654_v8 = vld [vmem:[%s2038_s25 + $0x80] sm:$0xff] }
 0x7dc   : > { %v1166_v10 = vmul.f32 %v1165_v9, %v1165_v9 }
 0x7de   : > { %v1167_v11 = vsel %vm1160_vm10, %v1166_v10, 0.0 }
 0x7df   : > { %1168 = vadd.xlane.f32.xlu1 %v1167_v11  ;;  %v1657_v11 = vld [vmem:[%s2038_s25 + $0x98] sm:$0xff] }
 0x7e0   : > { %v1907_v12 = vpack.c.bf16 %v1657_v11, %v1656_v61 }
 0x86c   : > { %v1169_v20 = vpop.xlane.xlu1 %1168 }
 0x86d   : > { %v1170_v21 = vmul.f32 0.03125, %v1169_v20  ;;  %v1372_v20 = vrot.slane %v507_v56, %v833_v23 }
 0x86f   : > { %v1171_v22 = vadd.f32 1e-12, %v1170_v21 }
 0x871   : > { %1932 = vrsqrt.f32 %v1171_v22 }
 0x87b   : > { %v1933_v27 = vpop.eup %1932 }
 0x87c   : > { %v1173_v28 = vmul.f32 %v1933_v27, %v1165_v9  ;;  %v1655_v9 = vld [vmem:[%s2038_s25 + $0x88] sm:$0xff] }
 0x87d   : > { %v1904_v10 = vpack.c.bf16 %v1655_v9, %v1654_v8 }
 0x87e   : > { %v1178_v30 = vmul.f32 %v1177_v26, %v1173_v28 }
 0x880   : > { %v1183_v31 = vadd.f32 %v1182_v29, %v1178_v30 }
 0x882   : > { %1806 = vmatmul.mubr.msk.f32.vlgmr.msra.gmra.mrb[6].mxu0 %vm609_vm4, %v1183_v31 }
 0x883   : > { %1835 = vmatprep.mubr.msk.f32.mxu0 %vm1951_vm5, %v1949_v16  ;;  %v503_v16 = vld [vmem:[%s469_s21 + $0x28] sm:$0xff]  ;;  %1905 = vmatpush3.bf16.msra.mxu0 %v1904_v10 }
 0x884   : > { %v1898_v38 = vpack.c.bf16 %v503_v16, %v502_v37  ;;  %1906 = vmatprep.subr.bf16.mxu0 %v1950_v43 }
 0x886   : > { %1899 = vmatpush3.bf16.msra.mxu1 %v1898_v38 }
 0x887   : > { %1900 = vmatprep.subr.bf16.mxu1 %v1950_v43  ;;  %1908 = vmatpush3.bf16.msra.mxu0 %v1907_v12  ;;  %v1382_v43 = vrot.slane %v507_v56, %v656_v15 }
 0x88a   : > { %1902 = vmatpush3.bf16.msra.mxu1 %v1901_v41 }
 0x955   : > { %v1259_v44 = vpop.f32.mrb[6].mxu0 }
 0x956   : > { %v1260_v45 = vadd.f32 %v1651_v42, %v1259_v44  ;;  %v1807_v46 = vpop.f32.mrb[7].mxu0 }
 0x958   : > { %v1263_v47 = vmul.f32 %v1260_v45, %v1260_v45 }
 0x95a   : > { %v1264_v48 = vmul.f32 %v1263_v47, %v1260_v45 }
 0x95c   : > { %v1265_v49 = vmul.f32 0.044715, %v1264_v48 }
 0x95e   : > { %v1266_v50 = vadd.f32 %v1265_v49, %v1260_v45 }
 0x960   : > { %v1267_v51 = vmul.f32 0.7978846, %v1266_v50 }
 0x962   : > { %1934 = vtanh.f32 %v1267_v51 }
 0x96c   : > { %v1935_v52 = vpop.eup %1934 }
 0x96d   : > { %v1269_v53 = vadd.f32 1.0, %v1935_v52 }
 0x96f   : > { %v1270_v54 = vmul.f32 0.5, %v1269_v53 }
 0x971   : > { %v1271_v55 = vmul.f32 %v1270_v54, %v1260_v45 }
 0x973   : > { %1825 = vmatmul.mubr.msk.f32.vlgmr.msra.gmra.mrb[8].mxu1 %vm1276_vm11, %v1271_v55 }
 0xa46   : > { %v1346_v58 = vpop.f32.mrb[8].mxu1 }
 0xa47   : > { %v1347_v60 = vadd.f32 %v1346_v58, %v1275_v57  ;;  %v1826_v0 = vpop.f32.mrb[9].mxu1 }
 0xa49   : > { %v1350_v1 = vadd.f32 %v1347_v60, %v1183_v31 }
 0xa4b   : > { %v1351_v2 = vsel %vm1160_vm10, %v1350_v1, 0.0 }
 0xa4c   : > { %1352 = vadd.xlane.f32.xlu1 %v1351_v2 }
 0xad9   : > { %v1353_v3 = vpop.xlane.xlu1 %1352 }
 0xada   : > { %v1354_v4 = vmul.f32 0.03125, %v1353_v3 }
 0xadc   : > { %v1355_v5 = vsub.f32 %v1350_v1, %v1354_v4 }
 0xade   : > { %v1356_v6 = vmul.f32 %v1355_v5, %v1355_v5 }
 0xae0   : > { %v1357_v7 = vsel %vm1160_vm10, %v1356_v6, 0.0 }
 0xae1   : > { %1358 = vadd.xlane.f32.xlu1 %v1357_v7 }
 0xb6e   : > { %v1359_v13 = vpop.xlane.xlu1 %1358 }
 0xb6f   : > { %v1360_v17 = vmul.f32 0.03125, %v1359_v13 }
 0xb71   : > { %v1361_v14 = vadd.f32 1e-12, %v1360_v17 }
 0xb73   : > { %1936 = vrsqrt.f32 %v1361_v14 }
 0xb7d   : > { %v1937_v19 = vpop.eup %1936 }
 0xb7e   : > { %v1363_v21 = vmul.f32 %v1937_v19, %v1355_v5 }
 0xb80   : > { %v1368_v22 = vmul.f32 %v1367_v18, %v1363_v21 }
 0xb82   : > { %v1373_v24 = vadd.f32 %v1372_v20, %v1368_v22 }
 0xb84   : > { %1836 = vmatmul.mubr.msk.f32.vlgmr.msra.gmra.mrb[8].mxu0 %vm609_vm4, %v1373_v24 }
 0xc57   : > { %v1452_v25 = vpop.f32.mrb[8].mxu0 }
 0xc58   : > { %v1453_v26 = vadd.f32 %v1452_v25, %v1382_v43  ;;  %v1837_v27 = vpop.f32.mrb[9].mxu0 }
 0xc5a   : > { %1938 = vtanh.f32 %v1453_v26 }
 0xc64   : > { %v1939_v63 = vpop.eup %1938 }
 0xc65   : > { %v1457_v23 = vsel %vm609_vm4, %v1939_v63, 0.0 }
 0xc66   : > { %1458 = vst [vmem:[%s481_s27] sm:$0x3] %v1457_v23 }
 0xc67 PF: > { %s19_s30 = sadd.s32 1, %s1946_s30  }
 0xc68   : > { %p16_p4 = scmp.ge.s32.totalorder %s19_s30, 4  }
 0xc6a   :  { %18 = sbr.rel (!%p16_p4) target bundleno = 1 (0x1), region = 114 }

</bundles_post_ra>
